<compile_context>
chip_gen: v5e
topology: v5e:2x2
jax: 0.10.0
libtpu: 0.0.40
codegen_flags: <defaults>
</compile_context>

<pallas_src>
import functools

import jax
import jax.numpy as jnp
from jax.experimental import pallas as pl
from jax.experimental.pallas import tpu as pltpu


def _round_up(x, m):
    return ((x + m - 1) // m) * m


def _choose_m_tiling(M, max_tm=256):
    """Row count padded to bf16 sublane packing (16) and a row-tile size <= max_tm."""
    Mp = _round_up(M, 16)
    if Mp <= max_tm:
        return Mp, Mp
    Mp = _round_up(M, max_tm)
    return Mp, max_tm


def _pad_rows(a, Mp):
    M = a.shape[0]
    return a if M == Mp else jnp.pad(a, ((0, Mp - M), (0, 0)))


def _apply_act(x, activation):
    if activation == "gelu":
        # TODO(synk): torch nn.GELU is exact-erf; tanh approximation used for safe Mosaic lowering.
        return jax.nn.gelu(x, approximate=True)
    if activation == "relu":
        return jnp.maximum(x, 0.0)
    return x


def _bcast_spec(shape):
    """Constant-block spec for 1-D grids (weights/biases revisited every step)."""
    zero = (0,) * len(shape)
    return pl.BlockSpec(shape, lambda i, _z=zero: _z)


# --------------------------------------------------------------------------------------
# Generic matmul kernels (single-shot when K fits one tile; k-grid fallback otherwise).
# Activations arrive f32 and are cast to bf16 in-kernel (no external HBM copy).
# --------------------------------------------------------------------------------------
_MAX_SINGLE_K = 2048


def _mm_kernel(a_ref, b_ref, bias_ref, o_ref, *, activation):
    out = jnp.dot(a_ref[...].astype(jnp.bfloat16), b_ref[...],
                  preferred_element_type=jnp.float32) + bias_ref[...]
    o_ref[...] = _apply_act(out, activation).astype(o_ref.dtype)


def _mm_acc_kernel(a_ref, b_ref, bias_ref, o_ref, acc_ref, *, activation):
    k = pl.program_id(2)

    @pl.when(k == 0)
    def _():
        acc_ref[...] = jnp.zeros_like(acc_ref)

    acc_ref[...] += jnp.dot(a_ref[...].astype(jnp.bfloat16), b_ref[...],
                            preferred_element_type=jnp.float32)

    @pl.when(k == pl.num_programs(2) - 1)
    def _():
        o_ref[...] = _apply_act(acc_ref[...] + bias_ref[...], activation).astype(o_ref.dtype)


def pallas_matmul(a, w_pad, bias_row, activation=None, out_dtype=jnp.float32):
    """act(a @ W + b).  a: (M, K) f32; w_pad: (Kp, Np) pre-padded bf16 weight; bias: (1, Np) f32.
    Returns the lane-padded (M, Np) result; callers slice the real columns."""
    M, K = a.shape
    Kp, Np = w_pad.shape
    if K != Kp:                                   # defensive; callers are lane-matched already
        a = jnp.pad(a, ((0, 0), (0, Kp - K)))
    Mp, tm = _choose_m_tiling(M)
    a = _pad_rows(a, Mp)
    tn = 256 if Np % 256 == 0 else min(128, Np)

    if Kp <= _MAX_SINGLE_K:
        out = pl.pallas_call(
            functools.partial(_mm_kernel, activation=activation),
            out_shape=jax.ShapeDtypeStruct((Mp, Np), out_dtype),
            grid_spec=pltpu.PrefetchScalarGridSpec(
                num_scalar_prefetch=0,
                grid=(Mp // tm, Np // tn),
                in_specs=[
                    pl.BlockSpec((tm, Kp), lambda i, j: (i, 0)),
                    pl.BlockSpec((Kp, tn), lambda i, j: (0, j)),
                    pl.BlockSpec((1, tn), lambda i, j: (0, j)),
                ],
                out_specs=pl.BlockSpec((tm, tn), lambda i, j: (i, j)),
            ),
            compiler_params=pltpu.CompilerParams(
                dimension_semantics=("parallel", "parallel")),
        )(a, w_pad, bias_row)
    else:
        tk = 512 if Kp % 512 == 0 else (256 if Kp % 256 == 0 else 128)
        out = pl.pallas_call(
            functools.partial(_mm_acc_kernel, activation=activation),
            out_shape=jax.ShapeDtypeStruct((Mp, Np), out_dtype),
            grid_spec=pltpu.PrefetchScalarGridSpec(
                num_scalar_prefetch=0,
                grid=(Mp // tm, Np // tn, Kp // tk),
                in_specs=[
                    pl.BlockSpec((tm, tk), lambda i, j, k: (i, k)),
                    pl.BlockSpec((tk, tn), lambda i, j, k: (k, j)),
                    pl.BlockSpec((1, tn), lambda i, j, k: (0, j)),
                ],
                out_specs=pl.BlockSpec((tm, tn), lambda i, j, k: (i, j)),
                scratch_shapes=[pltpu.VMEM((tm, tn), jnp.float32)],
            ),
            compiler_params=pltpu.CompilerParams(
                dimension_semantics=("parallel", "parallel", "arbitrary")),
        )(a, w_pad, bias_row)
    return out[:M]


# --------------------------------------------------------------------------------------
# Token reduction (lane-dense, tiled over the batch axis).
# --------------------------------------------------------------------------------------
def _reduce_tokens_kernel(x_ref, o_ref, *, mode):
    x = x_ref[...]                                     # (1, T, C)
    if mode == "max":
        o_ref[...] = jnp.max(x, axis=1, keepdims=True)
    else:
        o_ref[...] = jnp.mean(x, axis=1, keepdims=True)


def pallas_reduce_tokens(x, mode="max"):
    """(B, T, C) -> (B, C); `max` mode == F.adaptive_max_pool2d((1,1)) over the token grid."""
    B, T, C = x.shape
    out = pl.pallas_call(
        functools.partial(_reduce_tokens_kernel, mode=mode),
        out_shape=jax.ShapeDtypeStruct((B, 1, C), x.dtype),
        grid_spec=pltpu.PrefetchScalarGridSpec(
            num_scalar_prefetch=0,
            grid=(B,),
            in_specs=[pl.BlockSpec((1, T, C), lambda b: (b, 0, 0))],
            out_specs=pl.BlockSpec((1, 1, C), lambda b: (b, 0, 0)),
        ),
        compiler_params=pltpu.CompilerParams(dimension_semantics=("parallel",)),
    )(x)
    return out.reshape(B, C)


# --------------------------------------------------------------------------------------
# Fused encoder kernel: patch-embed -> MLP(GELU) with residual -> aux projection.
# Tiled over the token axis ("parallel").
# --------------------------------------------------------------------------------------
def _encoder_kernel(patch_ref, pw, pb, w1, b1, w2, b2, aw, ab, tok_ref, aux_ref):
    f32, bf16 = jnp.float32, jnp.bfloat16
    tok = jnp.dot(patch_ref[...].astype(bf16), pw[...], preferred_element_type=f32) + pb[...]
    hid = _apply_act(jnp.dot(tok.astype(bf16), w1[...], preferred_element_type=f32) + b1[...],
                     "gelu")
    tok = tok + jnp.dot(hid.astype(bf16), w2[...], preferred_element_type=f32) + b2[...]
    aux = jnp.dot(tok.astype(bf16), aw[...], preferred_element_type=f32) + ab[...]
    tok_ref[...] = tok
    aux_ref[...] = aux


def encoder_features(enc, x_nchw, patch_size):
    """x: (N, 3, H, W) NCHW -> (tok (Mp,128) f32, aux (Mp,128) f32, (N, h, w, M))."""
    N, C, H, W = x_nchw.shape
    h, w = H // patch_size, W // patch_size
    M = N * h * w
    K = patch_size * patch_size * C
    xh = jnp.transpose(x_nchw, (0, 2, 3, 1))
    patches = xh.reshape(N, h, patch_size, w, patch_size, C)
    patches = jnp.transpose(patches, (0, 1, 3, 2, 4, 5)).reshape(M, K)   # f32, K unpadded
    Mp, tm = _choose_m_tiling(M)
    patches = _pad_rows(patches, Mp)
    Dp = enc["patch_w"].shape[1]

    names = ("patch_w", "patch_b", "mlp_w1", "mlp_b1", "mlp_w2", "mlp_b2", "aux_w", "aux_b")
    tok_pad, aux_pad = pl.pallas_call(
        _encoder_kernel,
        out_shape=(jax.ShapeDtypeStruct((Mp, Dp), jnp.float32),
                   jax.ShapeDtypeStruct((Mp, Dp), jnp.float32)),
        grid_spec=pltpu.PrefetchScalarGridSpec(
            num_scalar_prefetch=0,
            grid=(Mp // tm,),
            in_specs=[pl.BlockSpec((tm, K), lambda i: (i, 0))]
                     + [_bcast_spec(enc[k].shape) for k in names],
            out_specs=[pl.BlockSpec((tm, Dp), lambda i: (i, 0)),
                       pl.BlockSpec((tm, Dp), lambda i: (i, 0))],
        ),
        compiler_params=pltpu.CompilerParams(dimension_semantics=("parallel",)),
    )(patches, *[enc[k] for k in names])
    return tok_pad, aux_pad, (N, h, w, M)


# --------------------------------------------------------------------------------------
# Fused CTC head kernel: 3x(Linear+GELU) -> L2 normalize -> weight-normed last layer.
# Uses bf16 shadow weights + pre-normalized weight-norm columns; tiled over rows.
# --------------------------------------------------------------------------------------
def _ctc_head_kernel(x_ref, w0, b0, w1, b1, w2, b2, vn, o_ref):
    f32, bf16 = jnp.float32, jnp.bfloat16
    h = jnp.dot(x_ref[...].astype(bf16), w0[...], preferred_element_type=f32) + b0[...]
    h = _apply_act(h, "gelu")
    h = jnp.dot(h.astype(bf16), w1[...], preferred_element_type=f32) + b1[...]
    h = _apply_act(h, "gelu")
    h = jnp.dot(h.astype(bf16), w2[...], preferred_element_type=f32) + b2[...]
    # F.normalize(dim=-1, p=2): rsqrt routes to the EUP slot; epilogue stays f32 (v5e-safe).
    inv = jax.lax.rsqrt(jnp.maximum(jnp.sum(h * h, axis=-1, keepdims=True), 1e-24))
    h = h * inv
    # weight-normed last layer: vn is the column-normalized weight, precomputed outside.
    o_ref[...] = jnp.dot(h.astype(bf16), vn[...], preferred_element_type=f32)


def make_head_shadow(p):
    """bf16 shadow of the f32 master head weights; weight-norm columns pre-normalized."""
    v = p["vT"]
    vinv = jax.lax.rsqrt(jnp.maximum(jnp.sum(v * v, axis=0, keepdims=True), 1e-24))
    return {
        "w0": p["w0"].astype(jnp.bfloat16), "b0": p["b0"],
        "w1": p["w1"].astype(jnp.bfloat16), "b1": p["b1"],
        "w2": p["w2"].astype(jnp.bfloat16), "b2": p["b2"],
        "vn": (v * vinv).astype(jnp.bfloat16),
    }


def ctc_head_forward(shadow, x, out_dim):
    """x: (M, 128) lane-padded f32 features -> (M, out_dim) f32."""
    M, C = x.shape
    Mp, tm = _choose_m_tiling(M)
    x = _pad_rows(x, Mp)
    Np = shadow["vn"].shape[1]
    names = ("w0", "b0", "w1", "b1", "w2", "b2", "vn")
    out = pl.pallas_call(
        _ctc_head_kernel,
        out_shape=jax.ShapeDtypeStruct((Mp, Np), jnp.float32),
        grid_spec=pltpu.PrefetchScalarGridSpec(
            num_scalar_prefetch=0,
            grid=(Mp // tm,),
            in_specs=[pl.BlockSpec((tm, C), lambda i: (i, 0))]
                     + [_bcast_spec(shadow[k].shape) for k in names],
            out_specs=pl.BlockSpec((tm, Np), lambda i: (i, 0)),
        ),
        compiler_params=pltpu.CompilerParams(dimension_semantics=("parallel",)),
    )(x, *[shadow[k] for k in names])
    return out[:M, :out_dim]


# --------------------------------------------------------------------------------------
# Fused decoder kernel (LargeFOV stand-in): conv3x3(dil)+ReLU -> conv3x3(dil)+ReLU -> conv1x1.
# Whole token grid resident in VMEM; im2col done in-kernel from a zero-haloed frame; stays
# 128-lane dense end to end.
# --------------------------------------------------------------------------------------
def _decoder_kernel(x_ref, w6, b6, w7, b7, w8, b8, o_ref, frame, *, dil):
    # TODO(synk): decoder.LargeFOV source is external; this fused stand-in assumes H*W small
    # enough to keep resident in VMEM (tile spatially for larger grids).
    f32, bf16 = jnp.float32, jnp.bfloat16
    N, H, W, C = x_ref.shape
    rows = N * H * W

    frame[...] = jnp.zeros_like(frame)                         # zero halo once
    frame[:, dil:dil + H, dil:dil + W, :] = x_ref[...]

    def conv3x3_relu(w_ref, b_ref):
        acc = None
        for t in range(9):                                     # unrolled taps
            ky, kx = divmod(t, 3)
            patch = frame[:, ky * dil:ky * dil + H, kx * dil:kx * dil + W, :]
            contrib = jnp.dot(patch.reshape(rows, C).astype(bf16), w_ref[t],
                              preferred_element_type=f32)
            acc = contrib if acc is None else acc + contrib
        return jnp.maximum(acc + b_ref[...], 0.0)

    y = conv3x3_relu(w6, b6)
    frame[:, dil:dil + H, dil:dil + W, :] = y.reshape(N, H, W, C)   # halo stays zero
    y = conv3x3_relu(w7, b7)
    y = jnp.dot(y.astype(bf16), w8[...], preferred_element_type=f32) + b8[...]
    o_ref[...] = y.reshape(N, H, W, C)


def decoder_forward(dec, x_nhwc):
    """x: (N, h, w, 128) lane-padded tokens -> (N, h, w, 128) lane-padded logits."""
    N, H, W, C = x_nhwc.shape
    dil = dec["dil"]
    Hp, Wp = H + 2 * dil, W + 2 * dil
    names = ("w6", "b6", "w7", "b7", "w8", "b8")
    return pl.pallas_call(
        functools.partial(_decoder_kernel, dil=dil),
        out_shape=jax.ShapeDtypeStruct((N, H, W, C), jnp.float32),
        grid=(1,),
        in_specs=[_bcast_spec((N, H, W, C))] + [_bcast_spec(dec[k].shape) for k in names],
        out_specs=_bcast_spec((N, H, W, C)),
        scratch_shapes=[pltpu.VMEM((N, Hp, Wp, C), jnp.float32)],
    )(x_nhwc, *[dec[k] for k in names])


# --------------------------------------------------------------------------------------
# Deterministic parameter construction (weights pre-padded / pre-packed once at init).
# --------------------------------------------------------------------------------------
def trunc_normal(key, shape, std=0.02):
    return std * jax.random.truncated_normal(key, -2.0, 2.0, shape, jnp.float32)


def _pad_w(w, to_bf16=True):
    k, n = w.shape
    wp = jnp.pad(w, ((0, _round_up(k, 128) - k), (0, _round_up(n, 128) - n)))
    return wp.astype(jnp.bfloat16) if to_bf16 else wp


def _pad_cols(w, to_bf16=True):
    k, n = w.shape
    wp = jnp.pad(w, ((0, 0), (0, _round_up(n, 128) - n)))
    return wp.astype(jnp.bfloat16) if to_bf16 else wp


def _bias_row(n):
    return jnp.zeros((1, _round_up(n, 128)), jnp.float32)


def init_encoder(key, in_chans=3, patch_size=4, embed_dim=32):
    # TODO(synk): the real ViT backbone (`encoder.<backbone>`) is external; a minimal
    # patch-embed + residual-MLP stand-in with an aux-layer projection is used instead.
    ks = jax.random.split(key, 4)
    d = embed_dim
    kpatch = patch_size * patch_size * in_chans
    return {
        "patch_w": _pad_cols(trunc_normal(ks[0], (kpatch, d))), "patch_b": _bias_row(d),
        "mlp_w1": _pad_w(trunc_normal(ks[1], (d, 2 * d))), "mlp_b1": _bias_row(2 * d),
        "mlp_w2": _pad_w(trunc_normal(ks[2], (2 * d, d))), "mlp_b2": _bias_row(d),
        "aux_w": _pad_w(trunc_normal(ks[3], (d, d))), "aux_b": _bias_row(d),
    }


def init_ctc_head(key, in_dim, out_dim, hidden_dim, bottleneck_dim):
    # f32 masters (EMA-updated); bf16 shadows for the kernel are built via make_head_shadow.
    ks = jax.random.split(key, 4)
    v = trunc_normal(ks[3], (out_dim, bottleneck_dim))   # torch Linear weight layout (out, in)
    return {
        "w0": _pad_w(trunc_normal(ks[0], (in_dim, hidden_dim)), False), "b0": _bias_row(hidden_dim),
        "w1": _pad_w(trunc_normal(ks[1], (hidden_dim, hidden_dim)), False), "b1": _bias_row(hidden_dim),
        "w2": _pad_w(trunc_normal(ks[2], (hidden_dim, bottleneck_dim)), False), "b2": _bias_row(bottleneck_dim),
        "vT": _pad_w(v.T, False),
    }


def init_decoder(key, in_planes, out_planes, hidden=64, dilation=5, lanes=128):
    # TODO(synk): decoder.LargeFOV source is external; stand-in mirrors the usual
    # conv3x3(dil) -> ReLU -> conv3x3(dil) -> ReLU -> conv1x1 structure (hidden=64, orig 512).
    ks = jax.random.split(key, 3)

    def tap_w(k, taps, cin, cout):
        w = trunc_normal(k, (taps, cin, cout))
        wp = jnp.zeros((taps, lanes, lanes), jnp.float32).at[:, :cin, :cout].set(w)
        return wp.astype(jnp.bfloat16)

    return {
        "w6": tap_w(ks[0], 9, in_planes, hidden), "b6": _bias_row(hidden),
        "w7": tap_w(ks[1], 9, hidden, hidden), "b7": _bias_row(hidden),
        "w8": tap_w(ks[2], 1, hidden, out_planes)[0], "b8": _bias_row(out_planes),
        "dil": dilation,
    }


# --------------------------------------------------------------------------------------
# network
# --------------------------------------------------------------------------------------
class Network:
    def __init__(self, key, num_classes=5, patch_size=4, embed_dim=32, init_momentum=0.996,
                 head_out_dim=128, head_hidden_dim=64, head_bottleneck_dim=32):
        # TODO(synk): CTCHead dims shrunk (orig hidden=2048, bottleneck=256, out=1024) for a
        # small synthetic demo; forward semantics (MLP/GELU -> L2-norm -> weight-normed linear)
        # are preserved exactly.
        self.num_classes = num_classes
        self.patch_size = patch_size
        self.embed_dim = embed_dim
        self.init_momentum = init_momentum
        self.head_out_dim = head_out_dim
        ks = jax.random.split(key, 6)
        self.enc = init_encoder(ks[0], 3, patch_size, embed_dim)
        self.proj_head = init_ctc_head(ks[1], embed_dim, head_out_dim,
                                       head_hidden_dim, head_bottleneck_dim)
        # teacher head initialized as an exact copy of the student head
        self.proj_head_t = jax.tree_util.tree_map(lambda a: a, self.proj_head)
        self.proj_head_bf16 = make_head_shadow(self.proj_head)
        self.proj_head_t_bf16 = make_head_shadow(self.proj_head_t)
        self.dec = init_decoder(ks[2], embed_dim, num_classes)
        # Conv2d 1x1, no-bias classifiers, batched into a single lane-dense matmul weight:
        #   cols [0, nc-1) -> classifier, cols [nc-1, 2(nc-1)) -> aux_classifier.
        nc1 = num_classes - 1
        cw = trunc_normal(ks[3], (embed_dim, nc1))
        aw = trunc_normal(ks[4], (embed_dim, nc1))
        both = jnp.zeros((_round_up(embed_dim, 128), _round_up(2 * nc1, 128)), jnp.float32)
        both = both.at[:embed_dim, :nc1].set(cw).at[:embed_dim, nc1:2 * nc1].set(aw)
        self.cls_w = both.astype(jnp.bfloat16)
        self.cls_b = jnp.zeros((1, both.shape[1]), jnp.float32)

    def _ema_update_encoder_teacher(self):
        m = self.init_momentum
        self.proj_head_t = jax.tree_util.tree_map(
            lambda pt, ps: m * pt + (1.0 - m) * ps, self.proj_head_t, self.proj_head)
        # refresh the bf16 shadow once per EMA step (not per kernel call)
        self.proj_head_t_bf16 = make_head_shadow(self.proj_head_t)

    def _tokens_to_nchw(self, tok_real, N, h, w):
        return jnp.transpose(tok_real.reshape(N, h, w, self.embed_dim), (0, 3, 1, 2))

    def forward_proj(self, crops, n_iter=None):
        global_view = crops[:2]
        local_view = crops[2:]
        g = jnp.concatenate(global_view, axis=0)
        local_inputs = jnp.concatenate(local_view, axis=0)
        self._ema_update_encoder_teacher()
        # Teacher and student share the same encoder, so the duplicated forward_features(g)
        # of the reference is computed once and reused (identical result in forward).
        tok_g, _, (Ng, hg, wg, Mg) = encoder_features(self.enc, g, self.patch_size)
        cls_g = pallas_reduce_tokens(tok_g[:Mg].reshape(Ng, hg * wg, -1), mode="mean")
        output_t = ctc_head_forward(self.proj_head_t_bf16, cls_g, self.head_out_dim)
        tok_l, _, (Nl, hl, wl, Ml) = encoder_features(self.enc, local_inputs, self.patch_size)
        cls_l = pallas_reduce_tokens(tok_l[:Ml].reshape(Nl, hl * wl, -1), mode="mean")
        output_s = ctc_head_forward(
            self.proj_head_bf16, jnp.concatenate([cls_g, cls_l], axis=0), self.head_out_dim)
        return output_t, output_s

    def forward(self, x, cam_only=False, crops=None, n_iter=None, MC=False, protype=False):
        N = x.shape[0]
        h, w = x.shape[-2] // self.patch_size, x.shape[-1] // self.patch_size
        T = h * w
        nc1 = self.num_classes - 1

        tok_pad, aux_pad, (_, _, _, M) = encoder_features(self.enc, x, self.patch_size)
        tok_r, aux_r = tok_pad[:M], aux_pad[:M]          # (M, 128) lane-padded f32

        if crops is not None:
            output_t, output_s = self.forward_proj(crops, n_iter)

        _x4 = self._tokens_to_nchw(tok_r[:, :self.embed_dim], N, h, w)   # (N, C, h, w)

        # shared lane-dense input for classifier / aux_classifier / cam matmuls (built once)
        cat = jnp.concatenate([tok_r, aux_r], axis=0)                    # (2M, 128)

        def cams_from(out_rows):
            cam = jnp.transpose(out_rows[:M, :nc1].reshape(N, h, w, nc1), (0, 3, 1, 2))
            cam_aux = jnp.transpose(
                out_rows[M:2 * M, nc1:2 * nc1].reshape(N, h, w, nc1), (0, 3, 1, 2))
            return cam, cam_aux

        if protype or cam_only:
            cam, cam_aux = cams_from(pallas_matmul(cat, self.cls_w, self.cls_b))
            if protype:
                return cam_aux, cam, _x4
            return cam_aux, cam

        # decoder stays 128-lane dense end to end; slice to num_classes at the boundary only
        seg_pad = decoder_forward(self.dec, tok_r.reshape(N, h, w, -1))
        seg = jnp.transpose(seg_pad[..., :self.num_classes], (0, 3, 1, 2))

        # adaptive_max_pool2d((1,1)) for both token streams in one batched reduce kernel
        pooled = pallas_reduce_tokens(cat.reshape(2 * N, T, -1), mode="max")

        if crops is None:
            cls_out = pallas_matmul(pooled, self.cls_w, self.cls_b)
            cls_x4 = cls_out[:N, :nc1]
            cls_aux = cls_out[N:2 * N, nc1:2 * nc1]
            return cls_x4, seg, _x4, cls_aux

        # crops path: batch pooled-classifier rows and cam rows into one lane-dense matmul
        all_out = pallas_matmul(jnp.concatenate([pooled, cat], axis=0), self.cls_w, self.cls_b)
        cls_x4 = all_out[:N, :nc1]
        cls_aux = all_out[N:2 * N, nc1:2 * nc1]
        cam = jnp.transpose(
            all_out[2 * N:2 * N + M, :nc1].reshape(N, h, w, nc1), (0, 3, 1, 2))
        return cls_x4, seg, _x4, cls_aux, output_t, output_s, cam


if __name__ == "__main__":
    key = jax.random.PRNGKey(0)
    k_param, k_x, k_c = jax.random.split(key, 3)
    net = Network(k_param, num_classes=5, patch_size=4, embed_dim=32, init_momentum=0.996)

    x = jax.random.normal(k_x, (2, 3, 16, 16), jnp.float32)
    kc = jax.random.split(k_c, 4)
    crops = [
        jax.random.normal(kc[0], (2, 3, 16, 16), jnp.float32),  # global view 1
        jax.random.normal(kc[1], (2, 3, 16, 16), jnp.float32),  # global view 2
        jax.random.normal(kc[2], (2, 3, 8, 8), jnp.float32),    # local view 1
        jax.random.normal(kc[3], (2, 3, 8, 8), jnp.float32),    # local view 2
    ]

    # default path (crops=None): (cls_x4, seg, _x4, cls_aux)
    out_plain = jax.block_until_ready(net.forward(x))
    # crops path exercises CTCHead student/teacher + EMA:
    out_crops = jax.block_until_ready(net.forward(x, crops=crops, n_iter=0))

    assert out_plain[0].shape == (2, 4)            # cls_x4
    assert out_plain[1].shape == (2, 5, 4, 4)      # seg
    assert out_plain[2].shape == (2, 32, 4, 4)     # _x4
    assert out_plain[3].shape == (2, 4)            # cls_aux
    assert out_crops[4].shape == (4, 128)          # output_t (2 global views concat)
    assert out_crops[5].shape == (8, 128)          # output_s (global + local)
    assert out_crops[6].shape == (2, 4, 4, 4)      # cam
    print("KERNEL_OK")
</pallas_src>

<mosaic_0001>
module attributes {stable_mosaic.version = 11 : i64} {
  func.func @_encoder_kernel(%arg0: i32, %arg1: memref<32x48xf32, #tpu.memory_space<vmem>>, %arg2: memref<48x128xbf16, #tpu.memory_space<vmem>>, %arg3: memref<1x128xf32, #tpu.memory_space<vmem>>, %arg4: memref<128x128xbf16, #tpu.memory_space<vmem>>, %arg5: memref<1x128xf32, #tpu.memory_space<vmem>>, %arg6: memref<128x128xbf16, #tpu.memory_space<vmem>>, %arg7: memref<1x128xf32, #tpu.memory_space<vmem>>, %arg8: memref<128x128xbf16, #tpu.memory_space<vmem>>, %arg9: memref<1x128xf32, #tpu.memory_space<vmem>>, %arg10: memref<32x128xf32, #tpu.memory_space<vmem>>, %arg11: memref<32x128xf32, #tpu.memory_space<vmem>>) attributes {dimension_semantics = [#tpu.dimension_semantics<parallel>], iteration_bounds = array<i64: 1>, scalar_prefetch = 0 : i64, scratch_operands = 0 : i64, tpu.core_type = #tpu.core_type<tc>, window_params = [{transform_indices = @transform_0, window_bounds = array<i64: 32, 48>}, {pipeline_mode = #tpu.pipeline_mode<synchronous>, transform_indices = @transform_1, window_bounds = array<i64: 48, 128>}, {pipeline_mode = #tpu.pipeline_mode<synchronous>, transform_indices = @transform_2, window_bounds = array<i64: 1, 128>}, {pipeline_mode = #tpu.pipeline_mode<synchronous>, transform_indices = @transform_3, window_bounds = array<i64: 128, 128>}, {pipeline_mode = #tpu.pipeline_mode<synchronous>, transform_indices = @transform_4, window_bounds = array<i64: 1, 128>}, {pipeline_mode = #tpu.pipeline_mode<synchronous>, transform_indices = @transform_5, window_bounds = array<i64: 128, 128>}, {pipeline_mode = #tpu.pipeline_mode<synchronous>, transform_indices = @transform_6, window_bounds = array<i64: 1, 128>}, {pipeline_mode = #tpu.pipeline_mode<synchronous>, transform_indices = @transform_7, window_bounds = array<i64: 128, 128>}, {pipeline_mode = #tpu.pipeline_mode<synchronous>, transform_indices = @transform_8, window_bounds = array<i64: 1, 128>}, {transform_indices = @transform_9, window_bounds = array<i64: 32, 128>}, {transform_indices = @transform_10, window_bounds = array<i64: 32, 128>}]} {
    %c0 = arith.constant 0 : index
    %c0_0 = arith.constant 0 : index
    %0 = vector.load %arg1[%c0, %c0_0] : memref<32x48xf32, #tpu.memory_space<vmem>>, vector<32x48xf32>
    %1 = arith.truncf %0 : vector<32x48xf32> to vector<32x48xbf16>
    %c0_1 = arith.constant 0 : index
    %c0_2 = arith.constant 0 : index
    %2 = vector.load %arg2[%c0_1, %c0_2] : memref<48x128xbf16, #tpu.memory_space<vmem>>, vector<48x128xbf16>
    %cst = arith.constant dense<0.000000e+00> : vector<32x128xf32>
    %3 = tpu.matmul %1, %2, %cst {dimension_numbers = #tpu.dot_dimension_numbers<[1], [0], [0], [1], [0, 0, 1, 1], [], []>} : vector<32x48xbf16>, vector<48x128xbf16>, vector<32x128xf32> -> vector<32x128xf32>
    %c0_3 = arith.constant 0 : index
    %c0_4 = arith.constant 0 : index
    %4 = vector.load %arg3[%c0_3, %c0_4] : memref<1x128xf32, #tpu.memory_space<vmem>>, vector<1x128xf32>
    %5 = vector.broadcast %4 : vector<1x128xf32> to vector<32x128xf32>
    %6 = arith.addf %3, %5 : vector<32x128xf32>
    %7 = arith.truncf %6 : vector<32x128xf32> to vector<32x128xbf16>
    %c0_5 = arith.constant 0 : index
    %c0_6 = arith.constant 0 : index
    %8 = vector.load %arg4[%c0_5, %c0_6] : memref<128x128xbf16, #tpu.memory_space<vmem>>, vector<128x128xbf16>
    %cst_7 = arith.constant dense<0.000000e+00> : vector<32x128xf32>
    %9 = tpu.matmul %7, %8, %cst_7 {dimension_numbers = #tpu.dot_dimension_numbers<[1], [0], [0], [1], [0, 0, 1, 1], [], []>} : vector<32x128xbf16>, vector<128x128xbf16>, vector<32x128xf32> -> vector<32x128xf32>
    %c0_8 = arith.constant 0 : index
    %c0_9 = arith.constant 0 : index
    %10 = vector.load %arg5[%c0_8, %c0_9] : memref<1x128xf32, #tpu.memory_space<vmem>>, vector<1x128xf32>
    %11 = vector.broadcast %10 : vector<1x128xf32> to vector<32x128xf32>
    %12 = arith.addf %9, %11 : vector<32x128xf32>
    %13 = arith.mulf %12, %12 : vector<32x128xf32>
    %14 = arith.mulf %12, %13 : vector<32x128xf32>
    %cst_10 = arith.constant 4.471500e-02 : f32
    %15 = vector.broadcast %cst_10 : f32 to vector<32x128xf32>
    %16 = arith.mulf %15, %14 : vector<32x128xf32>
    %17 = arith.addf %12, %16 : vector<32x128xf32>
    %cst_11 = arith.constant 0.797884583 : f32
    %18 = vector.broadcast %cst_11 : f32 to vector<32x128xf32>
    %19 = arith.mulf %18, %17 : vector<32x128xf32>
    %20 = math.tanh %19 : vector<32x128xf32>
    %cst_12 = arith.constant 1.000000e+00 : f32
    %21 = vector.broadcast %cst_12 : f32 to vector<32x128xf32>
    %22 = arith.addf %21, %20 : vector<32x128xf32>
    %cst_13 = arith.constant 5.000000e-01 : f32
    %23 = vector.broadcast %cst_13 : f32 to vector<32x128xf32>
    %24 = arith.mulf %23, %22 : vector<32x128xf32>
    %25 = arith.mulf %12, %24 : vector<32x128xf32>
    %26 = arith.truncf %25 : vector<32x128xf32> to vector<32x128xbf16>
    %c0_14 = arith.constant 0 : index
    %c0_15 = arith.constant 0 : index
    %27 = vector.load %arg6[%c0_14, %c0_15] : memref<128x128xbf16, #tpu.memory_space<vmem>>, vector<128x128xbf16>
    %cst_16 = arith.constant dense<0.000000e+00> : vector<32x128xf32>
    %28 = tpu.matmul %26, %27, %cst_16 {dimension_numbers = #tpu.dot_dimension_numbers<[1], [0], [0], [1], [0, 0, 1, 1], [], []>} : vector<32x128xbf16>, vector<128x128xbf16>, vector<32x128xf32> -> vector<32x128xf32>
    %29 = arith.addf %6, %28 : vector<32x128xf32>
    %c0_17 = arith.constant 0 : index
    %c0_18 = arith.constant 0 : index
    %30 = vector.load %arg7[%c0_17, %c0_18] : memref<1x128xf32, #tpu.memory_space<vmem>>, vector<1x128xf32>
    %31 = vector.broadcast %30 : vector<1x128xf32> to vector<32x128xf32>
    %32 = arith.addf %29, %31 : vector<32x128xf32>
    %33 = arith.truncf %32 : vector<32x128xf32> to vector<32x128xbf16>
    %c0_19 = arith.constant 0 : index
    %c0_20 = arith.constant 0 : index
    %34 = vector.load %arg8[%c0_19, %c0_20] : memref<128x128xbf16, #tpu.memory_space<vmem>>, vector<128x128xbf16>
    %cst_21 = arith.constant dense<0.000000e+00> : vector<32x128xf32>
    %35 = tpu.matmul %33, %34, %cst_21 {dimension_numbers = #tpu.dot_dimension_numbers<[1], [0], [0], [1], [0, 0, 1, 1], [], []>} : vector<32x128xbf16>, vector<128x128xbf16>, vector<32x128xf32> -> vector<32x128xf32>
    %c0_22 = arith.constant 0 : index
    %c0_23 = arith.constant 0 : index
    %36 = vector.load %arg9[%c0_22, %c0_23] : memref<1x128xf32, #tpu.memory_space<vmem>>, vector<1x128xf32>
    %37 = vector.broadcast %36 : vector<1x128xf32> to vector<32x128xf32>
    %38 = arith.addf %35, %37 : vector<32x128xf32>
    %c0_24 = arith.constant 0 : index
    %c0_25 = arith.constant 0 : index
    %39 = vector.load %arg10[%c0_24, %c0_25] : memref<32x128xf32, #tpu.memory_space<vmem>>, vector<32x128xf32>
    tpu.vector_store %arg10[%c0_24, %c0_25], %32 {strides = array<i32>} : memref<32x128xf32, #tpu.memory_space<vmem>>, vector<32x128xf32>,
    %c0_26 = arith.constant 0 : index
    %c0_27 = arith.constant 0 : index
    %40 = vector.load %arg11[%c0_26, %c0_27] : memref<32x128xf32, #tpu.memory_space<vmem>>, vector<32x128xf32>
    tpu.vector_store %arg11[%c0_26, %c0_27], %38 {strides = array<i32>} : memref<32x128xf32, #tpu.memory_space<vmem>>, vector<32x128xf32>,
    return
  }
  func.func @transform_0(%arg0: i32) -> (i32, i32) {
    %c0_i32 = arith.constant 0 : i32
    %c0_i32_0 = arith.constant 0 : i32
    return %arg0, %c0_i32 : i32, i32
  }
  func.func @transform_1(%arg0: i32) -> (i32, i32) {
    %c0_i32 = arith.constant 0 : i32
    %c0_i32_0 = arith.constant 0 : i32
    %c0_i32_1 = arith.constant 0 : i32
    return %c0_i32, %c0_i32_0 : i32, i32
  }
  func.func @transform_2(%arg0: i32) -> (i32, i32) {
    %c0_i32 = arith.constant 0 : i32
    %c0_i32_0 = arith.constant 0 : i32
    %c0_i32_1 = arith.constant 0 : i32
    return %c0_i32, %c0_i32_0 : i32, i32
  }
  func.func @transform_3(%arg0: i32) -> (i32, i32) {
    %c0_i32 = arith.constant 0 : i32
    %c0_i32_0 = arith.constant 0 : i32
    %c0_i32_1 = arith.constant 0 : i32
    return %c0_i32, %c0_i32_0 : i32, i32
  }
  func.func @transform_4(%arg0: i32) -> (i32, i32) {
    %c0_i32 = arith.constant 0 : i32
    %c0_i32_0 = arith.constant 0 : i32
    %c0_i32_1 = arith.constant 0 : i32
    return %c0_i32, %c0_i32_0 : i32, i32
  }
  func.func @transform_5(%arg0: i32) -> (i32, i32) {
    %c0_i32 = arith.constant 0 : i32
    %c0_i32_0 = arith.constant 0 : i32
    %c0_i32_1 = arith.constant 0 : i32
    return %c0_i32, %c0_i32_0 : i32, i32
  }
  func.func @transform_6(%arg0: i32) -> (i32, i32) {
    %c0_i32 = arith.constant 0 : i32
    %c0_i32_0 = arith.constant 0 : i32
    %c0_i32_1 = arith.constant 0 : i32
    return %c0_i32, %c0_i32_0 : i32, i32
  }
  func.func @transform_7(%arg0: i32) -> (i32, i32) {
    %c0_i32 = arith.constant 0 : i32
    %c0_i32_0 = arith.constant 0 : i32
    %c0_i32_1 = arith.constant 0 : i32
    return %c0_i32, %c0_i32_0 : i32, i32
  }
  func.func @transform_8(%arg0: i32) -> (i32, i32) {
    %c0_i32 = arith.constant 0 : i32
    %c0_i32_0 = arith.constant 0 : i32
    %c0_i32_1 = arith.constant 0 : i32
    return %c0_i32, %c0_i32_0 : i32, i32
  }
  func.func @transform_9(%arg0: i32) -> (i32, i32) {
    %c0_i32 = arith.constant 0 : i32
    %c0_i32_0 = arith.constant 0 : i32
    return %arg0, %c0_i32 : i32, i32
  }
  func.func @transform_10(%arg0: i32) -> (i32, i32) {
    %c0_i32 = arith.constant 0 : i32
    %c0_i32_0 = arith.constant 0 : i32
    return %arg0, %c0_i32 : i32, i32
  }
}

</mosaic_0001>

<bundles_post_ra>
// kernel: tpu_custom_call.1
= control target key start
LH: loop header
LB: loop body
LE: loop exit
PB: predicated region body
PF: predicated region fallthrough
CT: control target
= control target key end

     0   :  { %16 = vsyncpa [#allocation3], 0  ;;  %s1017_s0 = inlined_call_operand.hbm [shape: f32[32,48], index: 0, kind: input, shape index: {}]   ;;  %s1018_s1 = inlined_call_operand.hbm [shape: bf16[48,128], index: 1, kind: input, shape index: {}]   ;;  %s1019_s2 = inlined_call_operand.vmem [shape: f32[1,128], index: 2, kind: input, shape index: {}]   ;;  %s1020_s3 = inlined_call_operand.hbm [shape: bf16[128,128], index: 3, kind: input, shape index: {}]   ;;  %s1021_s4 = inlined_call_operand.vmem [shape: f32[1,128], index: 4, kind: input, shape index: {}]   ;;  %s1022_s5 = inlined_call_operand.hbm [shape: bf16[128,128], index: 5, kind: input, shape index: {}]   ;;  %s1023_s6 = inlined_call_operand.vmem [shape: f32[1,128], index: 6, kind: input, shape index: {}]   ;;  %s1024_s7 = inlined_call_operand.hbm [shape: bf16[128,128], index: 7, kind: input, shape index: {}]   ;;  %s1025_s8 = inlined_call_operand.vmem [shape: f32[1,128], index: 8, kind: input, shape index: {}]   ;;  %s1026_s9 = inlined_call_operand.hbm [shape: f32[32,128], index: 9, kind: output, shape index: {0}]   ;;  %s1027_s10 = inlined_call_operand.hbm [shape: f32[32,128], index: 10, kind: output, shape index: {1}]  }
   0x1   :  { %17 = vsyncpa [#allocation6], 0 }
   0x2   :  { %18 = vsyncpa [#allocation9], 0 }
   0x3   :  { %19 = vsyncpa [#allocation4], 0  ;;  %s38_s15 = sshll.u32 %s1018_s1, 4  ;;  %s39_s15 = int_to_ptr.hbm [resolvable:$true] %s38_s15 }
   0x4   :  { %20 = vsyncpa [#allocation13], 0  ;;  %s879_s16 = smov [#allocation5]   ;;  %s68_s20 = sshll.u32 %s1022_s5, 4  ;;  %s69_s20 = int_to_ptr.hbm [resolvable:$true] %s68_s20 }
   0x5   :  { %s40_s17 = sshll.u32 %s879_s16, 4  ;;  %s880_s21 = smov 64   ;;  %s41_s17 = int_to_ptr.vmem [resolvable:$true] %s40_s17 }
   0x6   :  { %s881_s22 = smov 4   ;;  %s882_s23 = smov [#allocation8]  }
   0x7   :  { %46 = dma.hbm_to_vmem [thread:$0]  %s39_s15, 384, %s41_s17, [#allocation6], %s880_s21, %s880_s21, %s881_s22  }
   0x8   :  { %s70_s24 = sshll.u32 %s882_s23, 4  ;;  %s25_s26 = sshll.u32 %s1017_s0, 4  ;;  %s71_s24 = int_to_ptr.vmem [resolvable:$true] %s70_s24  ;;  %s26_s26 = int_to_ptr.hbm [resolvable:$true] %s25_s26 }
   0x9   :  { %76 = dma.hbm_to_vmem [thread:$0]  %s69_s20, 1024, %s71_s24, [#allocation9], %s880_s21, %s880_s21, %s881_s22  }
   0xa   :  { %s883_s5 = smov [#allocation2]   ;;  %s53_s30 = sshll.u32 %s1020_s3, 4  ;;  %s54_s30 = int_to_ptr.hbm [resolvable:$true] %s53_s30 }
   0xb   :  { %s27_s27 = sshll.u32 %s883_s5, 4  ;;  %s884_s11 = smov 128   ;;  %s28_s27 = int_to_ptr.vmem [resolvable:$true] %s27_s27 }
   0xc   :  { %s885_s12 = smov 8   ;;  %s886_s0 = smov [#allocation7]  }
   0xd   :  { %33 = dma.hbm_to_vmem [thread:$0]  %s26_s26, 512, %s28_s27, [#allocation3], %s884_s11, %s884_s11, %s885_s12  }
   0xe   :  { %s55_s13 = sshll.u32 %s886_s0, 4  ;;  %s83_s16 = sshll.u32 %s1024_s7, 4  ;;  %s56_s13 = int_to_ptr.vmem [resolvable:$true] %s55_s13  ;;  %s84_s16 = int_to_ptr.hbm [resolvable:$true] %s83_s16 }
   0xf   :  { %61 = dma.hbm_to_vmem [thread:$0]  %s54_s30, 1024, %s56_s13, [#allocation6], %s880_s21, %s880_s21, %s881_s22  }
  0x10   :  { %s887_s3 = smov [#allocation10]  }
  0x11   :  { %s85_s17 = sshll.u32 %s887_s3, 4  ;;  %s86_s17 = int_to_ptr.vmem [resolvable:$true] %s85_s17 }
  0x12   :  { %91 = dma.hbm_to_vmem [thread:$0]  %s84_s16, 1024, %s86_s17, [#allocation9], %s880_s21, %s880_s21, %s881_s22  }
  0x13   :  { %869 = dma.done.wait [#allocation3], 512  }
  0x14   :  { %870 = vsyncadd [#allocation3], 4294966784 }
  0x15   :  { %871 = dma.done.wait [#allocation6], 1408  }
  0x16   :  { %872 = vsyncadd [#allocation6], 4294965888 }
  0x17   :  { %873 = dma.done.wait [#allocation9], 2048  }
  0x18   :  { %874 = vsyncadd [#allocation9], 4294965248  ;;  %v645_v0 = vld [vmem:[#allocation5 + $0x10] sm:$0xff]  ;;  %v644_v1 = vld [vmem:[#allocation5 + $0x8] sm:$0xff]  ;;  %vm149_vm0 = vcmask 392192   ;;  %s500_s24 = sshll.u32 %s1026_s9, 4  ;;  %s501_s24 = int_to_ptr.hbm [resolvable:$true] %s500_s24 }
  0x19   :  { %161 = vmatpush.bf16.msra.mxu0 %v645_v0  ;;  %v653_v2 = vld [vmem:[#allocation7 + $0x38] sm:$0xff]  ;;  %v643_v3 = vld [vmem:[#allocation5] sm:$0xff]  ;;  %v116_v5 = vld [vmem:[#allocation2 + $0x8] sm:$0xff]  ;;  %s889_s9 = smov [#allocation12]   ;;  %s513_s28 = sshll.u32 %s1027_s10, 4  ;;  %s514_s28 = int_to_ptr.hbm [resolvable:$true] %s513_s28 }
  0x1a   :  { %670 = vmatpush.bf16.msra.mxu1 %v653_v2  ;;  %v115_v4 = vld [vmem:[#allocation2] sm:$0xff]  ;;  %v652_v6 = vld [vmem:[#allocation7 + $0x30] sm:$0xff]  ;;  %v650_v9 = vld [vmem:[#allocation7 + $0x20] sm:$0xff]  ;;  %s511_s26 = sshll.u32 %s889_s9, 4  ;;  %s512_s26 = int_to_ptr.vmem [resolvable:$true] %s511_s26 }
  0x1b   :  { %v119_v7 = vpack.c.bf16 %v116_v5, %v115_v4  ;;  %v651_v8 = vld [vmem:[#allocation7 + $0x28] sm:$0xff]  ;;  %v649_v10 = vld [vmem:[#allocation7 + $0x18] sm:$0xff]  ;;  %v118_v12 = vld [vmem:[#allocation2 + $0x18] sm:$0xff] }
  0x1c   :  { %v117_v11 = vld [vmem:[#allocation2 + $0x10] sm:$0xff]  ;;  %v648_v14 = vld [vmem:[#allocation7 + $0x10] sm:$0xff]  ;;  %v647_v15 = vld [vmem:[#allocation7 + $0x8] sm:$0xff] }
  0x1d   :  { %162 = vmatpush.bf16.msra.mxu0 %v644_v1  ;;  %v120_v13 = vpack.c.bf16 %v118_v12, %v117_v11  ;;  %v646_v16 = vld [vmem:[#allocation7] sm:$0xff]  ;;  %v689_v18 = vld [vmem:[%s1019_s2] ss:$0 sm:$0xff]  ;;  %v661_v28 = vld [vmem:[#allocation8 + $0x38] sm:$0xff] }
  0x1e   :  { %671 = vmatpush.bf16.msra.mxu1 %v652_v6  ;;  %366 = vmatpush.bf16.msra.mxu2 %v661_v28  ;;  %v660_v29 = vld [vmem:[#allocation8 + $0x30] sm:$0xff]  ;;  %v659_v30 = vld [vmem:[#allocation8 + $0x28] sm:$0xff]  ;;  %v658_v31 = vld [vmem:[#allocation8 + $0x20] sm:$0xff] }
  0x1f   :  { %v657_v32 = vld [vmem:[#allocation8 + $0x18] sm:$0xff]  ;;  %v656_v33 = vld [vmem:[#allocation8 + $0x10] sm:$0xff]  ;;  %v655_v34 = vld [vmem:[#allocation8 + $0x8] sm:$0xff] }
  0x20   :  { %v690_v35 = vld [vmem:[%s1021_s4] ss:$0 sm:$0xff]  ;;  %v654_v36 = vld [vmem:[#allocation8] sm:$0xff]  ;;  %v669_v54 = vld [vmem:[#allocation10 + $0x38] sm:$0xff] }
  0x21   :  { %163 = vmatpush.bf16.msra.mxu0 %v643_v3  ;;  %467 = vmatpush.bf16.msra.mxu3 %v669_v54  ;;  %v668_v57 = vld [vmem:[#allocation10 + $0x30] sm:$0xff]  ;;  %v667_v63 = vld [vmem:[#allocation10 + $0x28] sm:$0xff] }
  0x22   :  { %672 = vmatpush.bf16.msra.mxu1 %v651_v8  ;;  %367 = vmatpush.bf16.msra.mxu2 %v660_v29  ;;  %v664_v28 = vld [vmem:[#allocation10 + $0x10] sm:$0xff]  ;;  %v663_v29 = vld [vmem:[#allocation10 + $0x8] sm:$0xff] }
  0x24   :  { %545 = vmatmul.msk.bf16.vlgmr.msra.gmra.mxu0 %vm149_vm0, %v119_v7  ;;  %v666_v7 = vld [vmem:[#allocation10 + $0x20] sm:$0xff] }
  0x25   :  { %245 = vmatpush.bf16.msrb.mxu0 %v653_v2  ;;  %468 = vmatpush.bf16.msra.mxu3 %v668_v57 }
  0x26   :  { %673 = vmatpush.bf16.msra.mxu1 %v650_v9  ;;  %368 = vmatpush.bf16.msra.mxu2 %v659_v30  ;;  %v662_v30 = vld [vmem:[#allocation10] sm:$0xff] }
  0x29   :  { %246 = vmatpush.bf16.msrb.mxu0 %v652_v6  ;;  %469 = vmatpush.bf16.msra.mxu3 %v667_v63 }
  0x2a   :  { %674 = vmatpush.bf16.msra.mxu1 %v649_v10  ;;  %369 = vmatpush.bf16.msra.mxu2 %v658_v31  ;;  %v691_v31 = vld [vmem:[%s1023_s6] ss:$0 sm:$0xff]  ;;  %s888_s6 = smov [#allocation11]  }
  0x2b   :  { %s498_s21 = sshll.u32 %s888_s6, 4  ;;  %s499_s21 = int_to_ptr.vmem [resolvable:$true] %s498_s21 }
  0x2d   :  { %247 = vmatpush.bf16.msrb.mxu0 %v651_v8  ;;  %470 = vmatpush.bf16.msra.mxu3 %v666_v7 }
  0x2e   :  { %675 = vmatpush.bf16.msra.mxu1 %v648_v14  ;;  %370 = vmatpush.bf16.msra.mxu2 %v657_v32 }
  0x31   :  { %248 = vmatpush.bf16.msrb.mxu0 %v650_v9 }
  0x32   :  { %676 = vmatpush.bf16.msra.mxu1 %v647_v15  ;;  %371 = vmatpush.bf16.msra.mxu2 %v656_v33 }
  0x34   :  { %546 = vmatmul.msk.bf16.gmra.mxu0 %vm149_vm0, %v120_v13 }
  0x35   :  { %249 = vmatpush.bf16.msrb.mxu0 %v649_v10 }
  0x36   :  { %677 = vmatpush.bf16.msra.mxu1 %v646_v16  ;;  %372 = vmatpush.bf16.msra.mxu2 %v655_v34 }
  0x39   :  { %250 = vmatpush.bf16.msrb.mxu0 %v648_v14 }
  0x3a   :  { %373 = vmatpush.bf16.msra.mxu2 %v654_v36 }
  0x3d   :  { %251 = vmatpush.bf16.msrb.mxu0 %v647_v15 }
  0x41   :  { %252 = vmatpush.bf16.msrb.mxu0 %v646_v16 }
  0xa1   :  { %v165_v17 = vpop.f32.mrf.mxu0 }
  0xa2   :  { %v980_v20 = vadd.f32 %v689_v18, %v165_v17 }
  0xa9   :  { %v167_v19 = vpop.f32.mrf.mxu0 }
  0xaa   :  { %v982_v21 = vadd.f32 %v689_v18, %v167_v19 }
  0xac   :  { %v175_v22 = vpack.c.bf16 %v982_v21, %v980_v20 }
  0xae   :  { %253 = vmatmul.bf16.vlgmr.msrb.gmra.mxu0 %v175_v22 }
  0xb1   :  { %v170_v23 = vpop.f32.mrf.mxu0 }
  0xb2   :  { %v986_v25 = vadd.f32 %v689_v18, %v170_v23 }
  0xb9   :  { %v172_v24 = vpop.f32.mrf.mxu0 }
  0xba   :  { %v988_v26 = vadd.f32 %v689_v18, %v172_v24 }
  0xbc   :  { %v176_v27 = vpack.c.bf16 %v988_v26, %v986_v25 }
  0xbe   :  { %258 = vmatmul.bf16.vlgmr.msra.gmra.mxu1 %v176_v27  ;;  %v665_v27 = vld [vmem:[#allocation10 + $0x18] sm:$0xff] }
  0xbf   :  { %471 = vmatpush.bf16.msra.mxu3 %v665_v27 }
  0xc3   :  { %472 = vmatpush.bf16.msra.mxu3 %v664_v28 }
  0xc7   :  { %473 = vmatpush.bf16.msra.mxu3 %v663_v29 }
  0xcb   :  { %474 = vmatpush.bf16.msra.mxu3 %v662_v30 }
 0x12b   :  { %v254_v37 = vpop.f32.mrf.mxu0 }
 0x12c   :  { %v255_v38 = vadd.f32 %v690_v35, %v254_v37 }
 0x12e   :  { %v264_v39 = vmul.f32 %v255_v38, %v255_v38 }
 0x130   :  { %v268_v40 = vmul.f32 %v264_v39, %v255_v38 }
 0x132   :  { %v272_v41 = vmul.f32 0.044715, %v268_v40 }
 0x133   :  { %v256_v42 = vpop.f32.mrf.mxu0 }
 0x134   :  { %v276_v43 = vadd.f32 %v272_v41, %v255_v38  ;;  %v257_v44 = vadd.f32 %v690_v35, %v256_v42 }
 0x136   :  { %v265_v45 = vmul.f32 %v257_v44, %v257_v44  ;;  %v280_v46 = vmul.f32 0.7978846, %v276_v43 }
 0x138   :  { %v269_v47 = vmul.f32 %v265_v45, %v257_v44  ;;  %693 = vtanh.f32 %v280_v46 }
 0x13a   :  { %v273_v48 = vmul.f32 0.044715, %v269_v47 }
 0x13b   :  { %v259_v49 = vpop.f32.mrf.mxu1 }
 0x13c   :  { %v277_v50 = vadd.f32 %v273_v48, %v257_v44  ;;  %v260_v51 = vadd.f32 %v690_v35, %v259_v49 }
 0x13e   :  { %v266_v52 = vmul.f32 %v260_v51, %v260_v51  ;;  %v281_v53 = vmul.f32 0.7978846, %v277_v50  ;;  %v694_v55 = vpop.eup %693 }
 0x13f   :  { %v288_v60 = vadd.f32 1.0, %v694_v55 }
 0x140   :  { %v270_v56 = vmul.f32 %v266_v52, %v260_v51  ;;  %695 = vtanh.f32 %v281_v53 }
 0x141   :  { %v292_v4 = vmul.f32 0.5, %v288_v60 }
 0x142   :  { %v274_v58 = vmul.f32 0.044715, %v270_v56 }
 0x143   :  { %v261_v59 = vpop.f32.mrf.mxu1  ;;  %v296_v9 = vmul.f32 %v292_v4, %v255_v38 }
 0x144   :  { %v278_v61 = vadd.f32 %v274_v58, %v260_v51  ;;  %v262_v62 = vadd.f32 %v690_v35, %v261_v59 }
 0x146   :  { %v696_v0 = vpop.eup %695  ;;  %v267_v1 = vmul.f32 %v262_v62, %v262_v62  ;;  %v282_v2 = vmul.f32 0.7978846, %v278_v61 }
 0x147   :  { %v289_v3 = vadd.f32 1.0, %v696_v0 }
 0x148   :  { %v271_v5 = vmul.f32 %v267_v1, %v262_v62  ;;  %697 = vtanh.f32 %v282_v2 }
 0x149   :  { %v293_v6 = vmul.f32 0.5, %v289_v3 }
 0x14a   :  { %v275_v8 = vmul.f32 0.044715, %v271_v5 }
 0x14b   :  { %v297_v10 = vmul.f32 %v293_v6, %v257_v44 }
 0x14c   :  { %v279_v11 = vadd.f32 %v275_v8, %v262_v62 }
 0x14d   :  { %v300_v12 = vpack.c.bf16 %v297_v10, %v296_v9 }
 0x14e   :  { %v283_v13 = vmul.f32 0.7978846, %v279_v11  ;;  %v698_v14 = vpop.eup %697 }
 0x14f   :  { %374 = vmatmul.bf16.vlgmr.msra.gmra.mxu2 %v300_v12  ;;  %v290_v15 = vadd.f32 1.0, %v698_v14 }
 0x150   :  { %699 = vtanh.f32 %v283_v13 }
 0x151   :  { %v294_v18 = vmul.f32 0.5, %v290_v15 }
 0x153   :  { %v298_v22 = vmul.f32 %v294_v18, %v260_v51 }
 0x156   :  { %v700_v16 = vpop.eup %699 }
 0x157   :  { %v291_v17 = vadd.f32 1.0, %v700_v16 }
 0x159   :  { %v295_v19 = vmul.f32 0.5, %v291_v17 }
 0x15b   :  { %v299_v23 = vmul.f32 %v295_v19, %v262_v62 }
 0x15d   :  { %v301_v24 = vpack.c.bf16 %v299_v23, %v298_v22 }
 0x15f   :  { %379 = vmatmul.bf16.gmra.mxu2 %v301_v24 }
 0x1d2   :  { %v375_v32 = vpop.f32.mrf.mxu2 }
 0x1d3   :  { %v385_v33 = vadd.f32 %v375_v32, %v980_v20 }
 0x1d5   :  { %v393_v34 = vadd.f32 %v691_v31, %v385_v33 }
 0x1d7   :  { %486 = vst [vmem:[#allocation11] sm:$0xff] %v393_v34 }
 0x1da   :  { %v377_v35 = vpop.f32.mrf.mxu2 }
 0x1db   :  { %v386_v36 = vadd.f32 %v377_v35, %v982_v21  ;;  %v692_v21 = vld [vmem:[%s1025_s8] ss:$0 sm:$0xff] }
 0x1dd   :  { %v394_v37 = vadd.f32 %v691_v31, %v386_v36 }
 0x1df   :  { %487 = vst [vmem:[#allocation11 + $0x8] sm:$0xff] %v394_v37  ;;  %v397_v38 = vpack.c.bf16 %v394_v37, %v393_v34 }
 0x1e1   :  { %475 = vmatmul.bf16.vlgmr.msra.gmra.mxu3 %v397_v38 }
 0x1e2   :  { %v380_v39 = vpop.f32.mrf.mxu2 }
 0x1e3   :  { %v387_v40 = vadd.f32 %v380_v39, %v986_v25 }
 0x1e5   :  { %v395_v41 = vadd.f32 %v691_v31, %v387_v40 }
 0x1e7   :  { %488 = vst [vmem:[#allocation11 + $0x10] sm:$0xff] %v395_v41 }
 0x1ea   :  { %v382_v42 = vpop.f32.mrf.mxu2 }
 0x1eb   :  { %v388_v43 = vadd.f32 %v382_v42, %v988_v26 }
 0x1ed   :  { %v396_v44 = vadd.f32 %v691_v31, %v388_v43 }
 0x1ef   :  { %489 = vst [vmem:[#allocation11 + $0x18] sm:$0xff] %v396_v44  ;;  %v398_v20 = vpack.c.bf16 %v396_v44, %v395_v41 }
 0x1f0   :  { %506 = dma.vmem_to_hbm [thread:$0]  %s499_s21, 512, %s501_s24, [#allocation4], %s884_s11, %s884_s11, %s885_s12  }
 0x1f1   :  { %480 = vmatmul.bf16.gmra.mxu3 %v398_v20 }
 0x264   :  { %v476_v25 = vpop.f32.mrf.mxu3 }
 0x265   :  { %v477_v26 = vadd.f32 %v692_v21, %v476_v25 }
 0x267   :  { %490 = vst [vmem:[#allocation12] sm:$0xff] %v477_v26 }
 0x26c   :  { %v478_v45 = vpop.f32.mrf.mxu3 }
 0x26d   :  { %v479_v46 = vadd.f32 %v692_v21, %v478_v45 }
 0x26f   :  { %491 = vst [vmem:[#allocation12 + $0x8] sm:$0xff] %v479_v46 }
 0x274   :  { %v481_v47 = vpop.f32.mrf.mxu3 }
 0x275   :  { %v482_v48 = vadd.f32 %v692_v21, %v481_v47 }
 0x277   :  { %492 = vst [vmem:[#allocation12 + $0x10] sm:$0xff] %v482_v48 }
 0x27c   :  { %v483_v49 = vpop.f32.mrf.mxu3 }
 0x27d   :  { %v484_v50 = vadd.f32 %v692_v21, %v483_v49 }
 0x27f   :  { %493 = vst [vmem:[#allocation12 + $0x18] sm:$0xff] %v484_v50 }
 0x280   :  { %519 = dma.vmem_to_hbm [thread:$0]  %s512_s26, 512, %s514_s28, [#allocation13], %s884_s11, %s884_s11, %s885_s12  }
 0x281   :  { %875 = dma.done.wait [#allocation4], 512  }
 0x282   :  { %876 = vsyncadd [#allocation4], 4294966784 }
 0x283   :  { %877 = dma.done.wait [#allocation13], 512  }
 0x284   :  { %878 = vsyncadd [#allocation13], 4294966784 }
 0x285   :  { %528 = vsyncpa [#allocation3], 1 }
 0x286   :  { %529 = vsyncpa [#allocation6], 1 }
 0x287   :  { %530 = vsyncpa [#allocation9], 1 }
 0x288   :  { %531 = vsyncpa [#allocation4], 1 }
 0x289   :  { %532 = vsyncpa [#allocation13], 1 }

</bundles_post_ra>
